<compile_context>
chip_gen: v7x
topology: tpu7x:2x2x1
jax: 0.10.0
libtpu: 0.0.40
codegen_flags: <defaults>
</compile_context>

<pallas_src>
import functools

import jax
import jax.numpy as jnp
from jax.experimental import pallas as pl
from jax.experimental.pallas import tpu as pltpu


def _round_up(x: int, m: int) -> int:
    return ((x + m - 1) // m) * m


def _sublane_multiple(dtype) -> int:
    # f32 -> 8, bf16 -> 16, int8/fp8 -> 32 (sublane packing of narrow dtypes).
    return max(8, 32 // jnp.dtype(dtype).itemsize)


def _num_tensorcores() -> int:
    try:
        return max(1, int(getattr(jax.devices()[0], "num_cores", 1)))
    except Exception:
        return 1


def _vmem_capacity_bytes() -> int:
    try:
        return int(pltpu.get_tpu_info().vmem_capacity_bytes)
    except Exception:
        return 128 * 1024 * 1024


def ffn_kernel(x_ref, w1_ref, b1_ref, w2_ref, b2_ref, o_ref, acc_ref, *, n_sub=1):
    # x_ref:  (tm, Dp)   compute dtype
    # w1_ref: (Dp, tf)   compute dtype     b1_ref: (1, tf)  f32
    # w2_ref: (tf, Dp)   compute dtype     b2_ref: (1, Dp)  f32
    # acc_ref: (tm, Dp) f32 accumulator, resident across the k (d_ff) axis.
    k = pl.program_id(1)

    @pl.when(k == 0)
    def _():
        # Fold b2 into the accumulator init (saves a (tm, Dp) add in the tail).
        acc_ref[...] = jnp.broadcast_to(b2_ref[...], acc_ref.shape)

    x = x_ref[...]
    tf = w1_ref.shape[1]
    tsub = tf // n_sub
    # Static sub-chunk loop: lets the LLO scheduler overlap the VPU
    # bias/ReLU/cast of one sub-chunk with the MXU matmul of the next.
    for s in range(n_sub):
        lo, hi = s * tsub, (s + 1) * tsub
        h = jnp.dot(x, w1_ref[:, lo:hi],
                    preferred_element_type=jnp.float32) + b1_ref[:, lo:hi]
        h = jnp.maximum(h, 0.0)
        acc_ref[...] += jnp.dot(h.astype(w2_ref.dtype), w2_ref[lo:hi, :],
                                preferred_element_type=jnp.float32)

    @pl.when(k == pl.num_programs(1) - 1)
    def _():
        o_ref[...] = acc_ref[...].astype(o_ref.dtype)


def _select_tiles(M, Dp, d_ff, compute_dtype, out_dtype, tm=None, tf=None):
    """Generation-aware tile selection under a VMEM budget."""
    c = jnp.dtype(compute_dtype).itemsize
    o = jnp.dtype(out_dtype).itemsize
    sub = _sublane_multiple(compute_dtype)

    vmem_cap = _vmem_capacity_bytes()
    budget = int(0.75 * vmem_cap)
    small_vmem = vmem_cap <= 96 * 1024 * 1024          # v7x-class (64 MiB / TC)

    # --- d_ff chunk: multiple of 256 for the 2x256x256 MXUs (v6e / v7x) -----
    if tf is None:
        tf = 256 if (small_vmem and Dp >= 4096) else 512
    if d_ff <= tf:
        tf = _round_up(d_ff, 128)
    else:
        tf = _round_up(tf, 256)

    # --- row tile: large enough to amortize per-row-tile weight re-streaming
    if tm is None:
        if jnp.dtype(compute_dtype) == jnp.dtype(jnp.bfloat16):
            tm = 512 if small_vmem else 1024            # v7x / v5e-v6e bf16
        else:
            tm = 512                                     # f32 needs >= 512
    tm = _round_up(min(tm, _round_up(M, sub)), sub)

    # Multi-TensorCore chips: ensure the "parallel" row axis has >= cores tiles.
    cores = _num_tensorcores()
    if cores > 1:
        per_core = _round_up(pl.cdiv(_round_up(M, sub), cores), sub)
        tm = max(sub, min(tm, per_core))

    def vmem_bytes(tm_, tf_):
        return (2 * (tm_ * Dp + Dp * tf_ + tf_ * Dp) * c   # dbl-buffered in tiles
                + 2 * (tf_ + Dp) * 4                       # f32 bias tiles
                + 2 * tm_ * Dp * o                         # dbl-buffered out tile
                + tm_ * Dp * 4)                            # f32 accumulator

    while vmem_bytes(tm, tf) > budget and tm > 4 * sub:
        tm = max(sub, _round_up(tm // 2, sub))
    while vmem_bytes(tm, tf) > budget and tf > 256 and tf % 256 == 0:
        tf = max(256, tf // 2)
        if d_ff <= tf:
            tf = _round_up(d_ff, 128)

    Fp = _round_up(d_ff, tf)
    return tm, tf, Fp, vmem_bytes(tm, tf), vmem_cap


def feed_forward(x, w1, b1, w2, b2, *, tm=None, tf=None,
                 compute_dtype=jnp.bfloat16):
    """x: (batch, seq, d_model) -> (batch, seq, d_model).

    w1: (d_model, d_ff), b1: (d_ff,), w2: (d_ff, d_model), b2: (d_model,)
    (weights already stored (in, out), i.e. transposed vs torch.nn.Linear).
    Matmuls run in `compute_dtype` on the MXU with f32 accumulation; biases are
    applied in f32; the output keeps x.dtype.
    """
    batch, seq, d_model = x.shape
    d_ff = w1.shape[1]
    M = batch * seq
    out_dtype = x.dtype
    c_item = jnp.dtype(compute_dtype).itemsize

    # Lane-dense padding of d_model (output last dim must be a 128 multiple).
    Dp = _round_up(d_model, 128)

    tm, tf, Fp, vmem_est, vmem_cap = _select_tiles(
        M, Dp, d_ff, compute_dtype, out_dtype, tm=tm, tf=tf)
    Mp = _round_up(M, tm)

    # --- zero-pad M, d_ff and d_model ---------------------------------------
    x2d = x.reshape(M, d_model)
    if Mp != M or Dp != d_model:
        x2d = jnp.pad(x2d, ((0, Mp - M), (0, Dp - d_model)))
    w1p, b1p, w2p, b2p = w1, b1, w2, b2
    if Fp != d_ff or Dp != d_model:
        w1p = jnp.pad(w1, ((0, Dp - d_model), (0, Fp - d_ff)))
        b1p = jnp.pad(b1, ((0, Fp - d_ff),))
        w2p = jnp.pad(w2, ((0, Fp - d_ff), (0, Dp - d_model)))
        b2p = jnp.pad(b2, ((0, Dp - d_model),))

    # Stream x / W1 / W2 in the (narrow) compute dtype; biases stay f32.
    x2d = x2d.astype(compute_dtype)
    w1p = w1p.astype(compute_dtype)
    w2p = w2p.astype(compute_dtype)
    b1_2d = b1p.reshape(1, Fp).astype(jnp.float32)
    b2_2d = b2p.reshape(1, Dp).astype(jnp.float32)

    grid = (Mp // tm, Fp // tf)
    n_sub = 2 if (tf >= 512 and tf % 256 == 0) else 1

    # Leave headroom above the estimated tile footprint, capped at the chip's
    # physical VMEM (important on v7x: 64 MiB per TensorCore).
    vmem_limit = int(min(vmem_cap,
                         max(32 * 1024 * 1024, vmem_est + (16 << 20))))

    cost = pl.CostEstimate(
        flops=4 * M * d_model * d_ff,            # two matmuls, 2 flops/MAC
        transcendentals=0,
        bytes_accessed=int(
            (x2d.size + Mp * Dp * jnp.dtype(out_dtype).itemsize // c_item) * c_item
            + (Mp // tm) * (w1p.size + w2p.size) * c_item     # weight re-streaming
            + (Mp // tm) * (b1_2d.size + b2_2d.size) * 4),
    )

    out2d = pl.pallas_call(
        functools.partial(ffn_kernel, n_sub=n_sub),
        out_shape=jax.ShapeDtypeStruct((Mp, Dp), out_dtype),
        grid_spec=pltpu.PrefetchScalarGridSpec(
            num_scalar_prefetch=0,
            grid=grid,
            in_specs=[
                pl.BlockSpec((tm, Dp), lambda i, k: (i, 0)),    # x row tile
                pl.BlockSpec((Dp, tf), lambda i, k: (0, k)),    # W1 col tile
                pl.BlockSpec((1, tf),  lambda i, k: (0, k)),    # b1 tile
                pl.BlockSpec((tf, Dp), lambda i, k: (k, 0)),    # W2 row tile
                pl.BlockSpec((1, Dp),  lambda i, k: (0, 0)),    # b2
            ],
            out_specs=pl.BlockSpec((tm, Dp), lambda i, k: (i, 0)),
            scratch_shapes=[pltpu.VMEM((tm, Dp), jnp.float32)],
        ),
        compiler_params=pltpu.CompilerParams(
            dimension_semantics=("parallel", "arbitrary"),
            vmem_limit_bytes=vmem_limit),
        cost_estimate=cost,
    )(x2d, w1p, b1_2d, w2p, b2_2d)

    return out2d[:M, :d_model].reshape(batch, seq, d_model)


if __name__ == "__main__":
    # Small, deterministic setup. d_ff=1024 with tf=512 exercises both the
    # d_ff reduction grid axis (2 k steps) and the in-kernel sub-chunk split.
    batch, seq, d_model, d_ff = 2, 8, 128, 1024

    key = jax.random.PRNGKey(0)
    kx, kw1, kb1, kw2, kb2 = jax.random.split(key, 5)

    x = jax.random.normal(kx, (batch, seq, d_model), dtype=jnp.float32)
    # Parameters stored as (in, out), i.e. already transposed vs torch Linear.
    w1 = jax.random.normal(kw1, (d_model, d_ff), dtype=jnp.float32) * 0.02
    b1 = jax.random.normal(kb1, (d_ff,), dtype=jnp.float32) * 0.02
    w2 = jax.random.normal(kw2, (d_ff, d_model), dtype=jnp.float32) * 0.02
    b2 = jax.random.normal(kb2, (d_model,), dtype=jnp.float32) * 0.02

    # High-precision pure-JAX reference of the fused FFN.
    hi = jax.lax.Precision.HIGHEST
    ref = jnp.maximum(jnp.dot(x, w1, precision=hi) + b1, 0.0)
    ref = jnp.dot(ref, w2, precision=hi) + b2

    # f32 streaming path (tight tolerance).
    out_f32 = feed_forward(x, w1, b1, w2, b2, tf=512, compute_dtype=jnp.float32)
    jax.block_until_ready(out_f32)
    assert out_f32.shape == (batch, seq, d_model)
    assert jnp.allclose(out_f32, ref, atol=5e-3, rtol=5e-3)

    # Default bf16 MXU path (f32 accumulation): looser tolerance.
    out_bf16 = feed_forward(x, w1, b1, w2, b2)
    jax.block_until_ready(out_bf16)
    assert out_bf16.shape == (batch, seq, d_model)
    assert jnp.allclose(out_bf16, ref, atol=3e-2, rtol=3e-2)

    print("KERNEL_OK")
</pallas_src>

<mosaic_0001>
module attributes {stable_mosaic.version = 11 : i64} {
  func.func @ffn_kernel(%arg0: i32, %arg1: i32, %arg2: memref<16x128xf32, #tpu.memory_space<vmem>>, %arg3: memref<128x512xf32, #tpu.memory_space<vmem>>, %arg4: memref<1x512xf32, #tpu.memory_space<vmem>>, %arg5: memref<512x128xf32, #tpu.memory_space<vmem>>, %arg6: memref<1x128xf32, #tpu.memory_space<vmem>>, %arg7: memref<16x128xf32, #tpu.memory_space<vmem>>, %arg8: memref<16x128xf32, #tpu.memory_space<vmem>>) attributes {dimension_semantics = [#tpu.dimension_semantics<parallel>, #tpu.dimension_semantics<arbitrary>], iteration_bounds = array<i64: 1, 2>, scalar_prefetch = 0 : i64, scratch_operands = 1 : i64, tpu.core_type = #tpu.core_type<tc>, window_params = [{transform_indices = @transform_0, window_bounds = array<i64: 16, 128>}, {transform_indices = @transform_1, window_bounds = array<i64: 128, 512>}, {transform_indices = @transform_2, window_bounds = array<i64: 1, 512>}, {transform_indices = @transform_3, window_bounds = array<i64: 512, 128>}, {pipeline_mode = #tpu.pipeline_mode<synchronous>, transform_indices = @transform_4, window_bounds = array<i64: 1, 128>}, {transform_indices = @transform_5, window_bounds = array<i64: 16, 128>}]} {
    %c0_i32 = arith.constant 0 : i32
    %0 = arith.cmpi eq, %arg1, %c0_i32 : i32
    %1 = arith.extui %0 : i1 to i32
    %c0_i32_0 = arith.constant 0 : i32
    %2 = arith.cmpi ne, %1, %c0_i32_0 : i32
    scf.if %2 {
      %c0_27 = arith.constant 0 : index
      %c0_28 = arith.constant 0 : index
      %31 = vector.load %arg6[%c0_27, %c0_28] : memref<1x128xf32, #tpu.memory_space<vmem>>, vector<1x128xf32>
      %32 = vector.shape_cast %31 : vector<1x128xf32> to vector<1x128xf32>
      %33 = vector.broadcast %32 : vector<1x128xf32> to vector<16x128xf32>
      %c0_29 = arith.constant 0 : index
      %c0_30 = arith.constant 0 : index
      %34 = vector.load %arg8[%c0_29, %c0_30] : memref<16x128xf32, #tpu.memory_space<vmem>>, vector<16x128xf32>
      tpu.vector_store %arg8[%c0_29, %c0_30], %33 {strides = array<i32>} : memref<16x128xf32, #tpu.memory_space<vmem>>, vector<16x128xf32>,
    } else {
    }
    %c0 = arith.constant 0 : index
    %c0_1 = arith.constant 0 : index
    %3 = vector.load %arg2[%c0, %c0_1] : memref<16x128xf32, #tpu.memory_space<vmem>>, vector<16x128xf32>
    %c0_2 = arith.constant 0 : index
    %c0_3 = arith.constant 0 : index
    %4 = vector.load %arg3[%c0_2, %c0_3] : memref<128x512xf32, #tpu.memory_space<vmem>>, vector<128x256xf32>
    %cst = arith.constant dense<0.000000e+00> : vector<16x256xf32>
    %5 = tpu.matmul %3, %4, %cst {dimension_numbers = #tpu.dot_dimension_numbers<[1], [0], [0], [1], [0, 0, 1, 1], [], []>} : vector<16x128xf32>, vector<128x256xf32>, vector<16x256xf32> -> vector<16x256xf32>
    %c0_4 = arith.constant 0 : index
    %c0_5 = arith.constant 0 : index
    %6 = vector.load %arg4[%c0_4, %c0_5] : memref<1x512xf32, #tpu.memory_space<vmem>>, vector<1x256xf32>
    %7 = vector.broadcast %6 : vector<1x256xf32> to vector<16x256xf32>
    %8 = arith.addf %5, %7 : vector<16x256xf32>
    %cst_6 = arith.constant 0.000000e+00 : f32
    %9 = vector.broadcast %cst_6 : f32 to vector<16x256xf32>
    %10 = arith.maximumf %8, %9 : vector<16x256xf32>
    %c0_7 = arith.constant 0 : index
    %c0_8 = arith.constant 0 : index
    %11 = vector.load %arg8[%c0_7, %c0_8] : memref<16x128xf32, #tpu.memory_space<vmem>>, vector<16x128xf32>
    %c0_9 = arith.constant 0 : index
    %c0_10 = arith.constant 0 : index
    %12 = vector.load %arg5[%c0_9, %c0_10] : memref<512x128xf32, #tpu.memory_space<vmem>>, vector<256x128xf32>
    %cst_11 = arith.constant dense<0.000000e+00> : vector<16x128xf32>
    %13 = tpu.matmul %10, %12, %cst_11 {dimension_numbers = #tpu.dot_dimension_numbers<[1], [0], [0], [1], [0, 0, 1, 1], [], []>} : vector<16x256xf32>, vector<256x128xf32>, vector<16x128xf32> -> vector<16x128xf32>
    %14 = arith.addf %11, %13 : vector<16x128xf32>
    %c0_12 = arith.constant 0 : index
    %c0_13 = arith.constant 0 : index
    %15 = vector.load %arg8[%c0_12, %c0_13] : memref<16x128xf32, #tpu.memory_space<vmem>>, vector<16x128xf32>
    tpu.vector_store %arg8[%c0_12, %c0_13], %14 {strides = array<i32>} : memref<16x128xf32, #tpu.memory_space<vmem>>, vector<16x128xf32>,
    %c0_14 = arith.constant 0 : index
    %c256 = arith.constant 256 : index
    %16 = vector.load %arg3[%c0_14, %c256] : memref<128x512xf32, #tpu.memory_space<vmem>>, vector<128x256xf32>
    %cst_15 = arith.constant dense<0.000000e+00> : vector<16x256xf32>
    %17 = tpu.matmul %3, %16, %cst_15 {dimension_numbers = #tpu.dot_dimension_numbers<[1], [0], [0], [1], [0, 0, 1, 1], [], []>} : vector<16x128xf32>, vector<128x256xf32>, vector<16x256xf32> -> vector<16x256xf32>
    %c0_16 = arith.constant 0 : index
    %c256_17 = arith.constant 256 : index
    %18 = vector.load %arg4[%c0_16, %c256_17] : memref<1x512xf32, #tpu.memory_space<vmem>>, vector<1x256xf32>
    %19 = vector.broadcast %18 : vector<1x256xf32> to vector<16x256xf32>
    %20 = arith.addf %17, %19 : vector<16x256xf32>
    %cst_18 = arith.constant 0.000000e+00 : f32
    %21 = vector.broadcast %cst_18 : f32 to vector<16x256xf32>
    %22 = arith.maximumf %20, %21 : vector<16x256xf32>
    %c0_19 = arith.constant 0 : index
    %c0_20 = arith.constant 0 : index
    %23 = vector.load %arg8[%c0_19, %c0_20] : memref<16x128xf32, #tpu.memory_space<vmem>>, vector<16x128xf32>
    %c256_21 = arith.constant 256 : index
    %c0_22 = arith.constant 0 : index
    %24 = vector.load %arg5[%c256_21, %c0_22] : memref<512x128xf32, #tpu.memory_space<vmem>>, vector<256x128xf32>
    %cst_23 = arith.constant dense<0.000000e+00> : vector<16x128xf32>
    %25 = tpu.matmul %22, %24, %cst_23 {dimension_numbers = #tpu.dot_dimension_numbers<[1], [0], [0], [1], [0, 0, 1, 1], [], []>} : vector<16x256xf32>, vector<256x128xf32>, vector<16x128xf32> -> vector<16x128xf32>
    %26 = arith.addf %23, %25 : vector<16x128xf32>
    %c0_24 = arith.constant 0 : index
    %c0_25 = arith.constant 0 : index
    %27 = vector.load %arg8[%c0_24, %c0_25] : memref<16x128xf32, #tpu.memory_space<vmem>>, vector<16x128xf32>
    tpu.vector_store %arg8[%c0_24, %c0_25], %26 {strides = array<i32>} : memref<16x128xf32, #tpu.memory_space<vmem>>, vector<16x128xf32>,
    %c1_i32 = arith.constant 1 : i32
    %28 = arith.cmpi eq, %arg1, %c1_i32 : i32
    %29 = arith.extui %28 : i1 to i32
    %c0_i32_26 = arith.constant 0 : i32
    %30 = arith.cmpi ne, %29, %c0_i32_26 : i32
    scf.if %30 {
      %c0_27 = arith.constant 0 : index
      %c0_28 = arith.constant 0 : index
      %31 = vector.load %arg8[%c0_27, %c0_28] : memref<16x128xf32, #tpu.memory_space<vmem>>, vector<16x128xf32>
      %c0_29 = arith.constant 0 : index
      %c0_30 = arith.constant 0 : index
      %32 = vector.load %arg7[%c0_29, %c0_30] : memref<16x128xf32, #tpu.memory_space<vmem>>, vector<16x128xf32>
      tpu.vector_store %arg7[%c0_29, %c0_30], %31 {strides = array<i32>} : memref<16x128xf32, #tpu.memory_space<vmem>>, vector<16x128xf32>,
    } else {
    }
    return
  }
  func.func @transform_0(%arg0: i32, %arg1: i32) -> (i32, i32) {
    %c0_i32 = arith.constant 0 : i32
    %c0_i32_0 = arith.constant 0 : i32
    return %arg0, %c0_i32 : i32, i32
  }
  func.func @transform_1(%arg0: i32, %arg1: i32) -> (i32, i32) {
    %c0_i32 = arith.constant 0 : i32
    %c0_i32_0 = arith.constant 0 : i32
    return %c0_i32, %arg1 : i32, i32
  }
  func.func @transform_2(%arg0: i32, %arg1: i32) -> (i32, i32) {
    %c0_i32 = arith.constant 0 : i32
    %c0_i32_0 = arith.constant 0 : i32
    return %c0_i32, %arg1 : i32, i32
  }
  func.func @transform_3(%arg0: i32, %arg1: i32) -> (i32, i32) {
    %c0_i32 = arith.constant 0 : i32
    %c0_i32_0 = arith.constant 0 : i32
    return %arg1, %c0_i32 : i32, i32
  }
  func.func @transform_4(%arg0: i32, %arg1: i32) -> (i32, i32) {
    %c0_i32 = arith.constant 0 : i32
    %c0_i32_0 = arith.constant 0 : i32
    %c0_i32_1 = arith.constant 0 : i32
    return %c0_i32, %c0_i32_0 : i32, i32
  }
  func.func @transform_5(%arg0: i32, %arg1: i32) -> (i32, i32) {
    %c0_i32 = arith.constant 0 : i32
    %c0_i32_0 = arith.constant 0 : i32
    return %arg0, %c0_i32 : i32, i32
  }
}

</mosaic_0001>

<bundles_post_ra>
// kernel: tpu_custom_call.1
= control target key start
LH: loop header
LB: loop body
LE: loop exit
PB: predicated region body
PF: predicated region fallthrough
CT: control target
= control target key end

     0   :  { %s1988_s0 = inlined_call_operand.hbm [shape: f32[16,128], index: 0, kind: input, shape index: {}]   ;;  %s1989_s1 = inlined_call_operand.hbm [shape: f32[128,1024], index: 1, kind: input, shape index: {}]   ;;  %s1990_s2 = inlined_call_operand.hbm [shape: f32[1,1024], index: 2, kind: input, shape index: {}]   ;;  %s1991_s3 = inlined_call_operand.hbm [shape: f32[1024,128], index: 3, kind: input, shape index: {}]   ;;  %s1992_s4 = inlined_call_operand.vmem [shape: f32[1,128], index: 4, kind: input, shape index: {}]   ;;  %s1993_s5 = inlined_call_operand.hbm [shape: f32[16,128], index: 5, kind: output, shape index: {}]  }
   0x1   :  { %2003 = sst [smem:[#allocation18_spill]] %s1989_s1 }
   0x2   :  { %10 = vsyncpa [#allocation4], 0 }
   0x3   :  { %11 = vsyncpa [#allocation7], 0 }
   0x4   :  { %13 = vsyncpa [#allocation7 + $0x1], 0 }
   0x5   :  { %14 = vsyncpa [#allocation10], 0 }
   0x6   :  { %16 = vsyncpa [#allocation10 + $0x1], 0 }
   0x7   :  { %17 = vsyncpa [#allocation5], 0  ;;  %s1554_s18 = smov 0   ;;  %s1556_s19 = smov 0  }
   0x8   :  { %s1558_s20 = smov 0   ;;  %s1560_s21 = smov 0  }
   0x9   :  { %s1562_s22 = smov 0   ;;  %s1564_s23 = smov 0  }
   0xa LB: > { %s32_s24 = sadd.s32 1, %s1505_s22  ;;  %s68_s25 = sadd.s32 1, %s1497_s20  ;;  %s1509_s23 = sphi %s1564_s23, %s23_s23   ;;  %s1505_s22 = sphi %s1562_s22, %s2025_s22   ;;  %s1501_s21 = sphi %s1560_s21, %s2024_s21   ;;  %s1497_s20 = sphi %s1558_s20, %s2023_s20   ;;  %s1493_s19 = sphi %s1556_s19, %s2022_s19   ;;  %s1489_s18 = sphi %s1554_s18, %s2021_s18  }
   0xb   : > { %p33_p0 = scmp.ge.s32.totalorder %s32_s24, 2  ;;  %p75_p1 = scmp.ne.s32.totalorder %s1497_s20, %s1493_s19 }
   0xc   : > { %p76_p2 = scmp.eq.s32.totalorder %s1509_s23, 0  ;;  %p1241_p4 = scmp.lt.s32.totalorder %s1509_s23, 2 }
   0xd   : > { %s2027_s24 = smov (%p33_p0, %s32_s24), 0  ;;  %s223_s27 = sand.u32 1, %s1509_s23  }
   0xe   : > { %2004 = sst [smem:[#allocation16_spill]] %s2027_s24  ;;  %p77_p3 = por %p76_p2, %p75_p1 }
   0xf   : > { %s65_s26 = ssub.s32 %s1505_s22, %s2027_s24  ;;  %s1596_s28 = sand.u32 1, %s1497_s20  }
  0x10   : > { %p66_p5 = scmp.eq.s32.totalorder %s65_s26, 0  ;;  %s1005_s29 = sshll.u32 %s1505_s22, 9 }
  0x11   : > { %s1994_s6 = sshll.u32 %s1596_s28, 9  ;;  %s2006_s1 = sld [smem:[#allocation18_spill]] }
  0x12   : > { %s1600_s30 = scalar_select %p66_p5, %s1497_s20, %s68_s25  }
  0x13   : > { %p1608_p6 = pnand %p1241_p4, %p77_p3  ;;  %s227_s11 = scalar_lea.vmem [#allocation6], %s1994_s6 }
  0x14   : > { %2005 = sst [smem:[#allocation17_spill]] %s1600_s30  ;;  %s234_s12 = sshll.u32 %s227_s11, 4  ;;  %s1614_s12 = int_to_ptr.vmem [resolvable:$true] %s234_s12 }
  0x15   : > { %s2007_s10 = scalar_select %p1608_p6, 1, 0 }
  0x16   : > { %s1616_s13 = scalar_lea.sflag [#allocation7], %s223_s27  ;;  %p1622_p8 = pneg %p1608_p6 }
  0x17   : > { %s1606_s9 = scalar_lea.hbm %s2006_s1, %s1005_s29  ;;  %s1308_s25 = scalar_lea.hbm %s2006_s1, 16384 }
  0x18   : > { %s1303_s14 = scalar_lea.hbm %s1606_s9, 8192  ;;  %p1309_p11 = scmp.lt.u32.totalorder %s1606_s9, %s2006_s1 }
  0x19   : > { %p1304_p7 = scmp.ne.s32.totalorder %s1606_s9, %s1303_s14  ;;  %p1310_p12 = scmp.lt.u32.totalorder %s1308_s25, %s1303_s14 }
  0x1a   : > { %s2008_s15 = scalar_select %p1622_p8, 1, 0 }
  0x1b   : > { %p1306_p9 = pnand %p1622_p8, %p1304_p7  ;;  %p1311_p13 = por %p1310_p12, %p1309_p11 }
  0x1c   : > { %p1312_p0 = scmp.lt.u32.totalorder %s1303_s14, %s1606_s9 }
  0x1d   : > { %p1307_p10 = pneg %p1306_p9 }
  0x1e   : > { %p1313_p1 = por %p1312_p0, %p1311_p13 }
  0x20   : > { %p1314_p2 = pnand %p1313_p1, %p1307_p10 }
  0x22   : > { %1317 = shalt.err (!%p1314_p2)
}
  0x23   : > { %s1318_s27 = scalar_lea.vmem %s1614_s12, 8192  ;;  %s1511_s7 = smov [#allocation6]  }
  0x24   : > { %p1319_p3 = scmp.ne.s32.totalorder %s1614_s12, %s1318_s27  ;;  %s1323_s8 = sshll.u32 %s1511_s7, 4  ;;  %s1324_s8 = int_to_ptr.vmem [resolvable:$false] %s1323_s8 }
  0x25   : > { %s1325_s11 = scalar_lea.vmem %s1324_s8, 16384  ;;  %p1326_p7 = scmp.lt.s32.totalorder %s1614_s12, %s1324_s8 }
  0x26   : > { %p1321_p4 = pnand %p1319_p3, %p1622_p8  ;;  %p1327_p9 = scmp.lt.s32.totalorder %s1325_s11, %s1318_s27 }
  0x28   : > { %p1322_p5 = pneg %p1321_p4  ;;  %p1328_p11 = por %p1327_p9, %p1326_p7 }
  0x2a   : > { %p1329_p12 = pnand %p1328_p11, %p1322_p5 }
  0x2c   : > { %1332 = shalt.err (!%p1329_p12)
}
  0x2d   : > { %s1512_s14 = smov 1024   ;;  %s1513_s16 = smov 512  }
  0x2e   : > { %s1514_s17 = smov 32   ;;  %s1647_s25 = sadd.s32 4294967295, %s1509_s23  }
  0x2f   : > { %1233 = dma.hbm_to_vmem [thread:$0]  (!%p1608_p6), %s1606_s9, 8192, %s1614_s12, %s1616_s13, %s1512_s14, %s1513_s16, %s1514_s17  }
  0x30   : > { %p81_p10 = scmp.ne.s32.totalorder %s1493_s19, %s1489_s18  ;;  %p1996_p13 = scmp.eq.s32.totalorder %s1647_s25, 0 }
  0x31   : > { %p981_p0 = scmp.ge.s32.totalorder %s1509_s23, 1  ;;  %p191_p1 = scmp.lt.s32.totalorder %s1509_s23, 3 }
  0x32   : > { %p1656_p2 = por %p1996_p13, %p81_p10  ;;  %s1515_s9 = smov [#allocation3]  }
  0x33   : > { %p1660_p3 = pnand %p981_p0, %p191_p1  ;;  %s206_s12 = sshll.u32 %s1515_s9, 4  ;;  %s1664_s12 = int_to_ptr.vmem [resolvable:$true] %s206_s12 }
  0x34   : > { %s2009_s26 = scalar_select %p1656_p2, 1, 0 }
  0x35   : > { %s2010_s29 = scalar_select %p1660_p3, 1, 0 }
  0x36   : > { %p1226_p4 = pneg %p1660_p3  ;;  %s987_s18 = sshll.u32 %s1596_s28, 2 }
  0x37   : > { %s1006_s27 = sshll.u32 %s1505_s22, 6  ;;  %s248_s16 = scalar_lea.vmem [#allocation8], %s987_s18 }
  0x38   : > { %p1672_p5 = pnand %p1226_p4, %p1996_p13  ;;  %s1679_s14 = scalar_lea.hbm %s1990_s2, %s1006_s27 }
  0x39   : > { %s256_s17 = sshll.u32 %s248_s16, 4  ;;  %s1333_s1 = scalar_lea.hbm %s1988_s0, 256  ;;  %s1681_s17 = int_to_ptr.vmem [resolvable:$true] %s256_s17 }
  0x3a   : > { %p1334_p7 = scmp.ne.s32.totalorder %s1988_s0, %s1333_s1  ;;  %p1335_p9 = pneg %p1672_p5 }
  0x3b   : > { %p1340_p10 = scmp.lt.u32.totalorder %s1333_s1, %s1988_s0 }
  0x3c   : > { %p1336_p11 = pnand %p1335_p9, %p1334_p7 }
  0x3e   : > { %p1337_p12 = pneg %p1336_p11 }
  0x40   : > { %p1342_p0 = pnand %p1340_p10, %p1337_p12 }
  0x42   : > { %1345 = shalt.err (!%p1342_p0)
}
  0x43   : > { %s1346_s18 = scalar_lea.vmem %s1664_s12, 256  ;;  %p1354_p2 = scmp.lt.s32.totalorder %s1664_s12, %s1664_s12 }
  0x44   : > { %p1347_p1 = scmp.ne.s32.totalorder %s1664_s12, %s1346_s18  ;;  %p1355_p3 = scmp.lt.s32.totalorder %s1346_s18, %s1346_s18 }
  0x46   : > { %p1349_p4 = pnand %p1347_p1, %p1335_p9  ;;  %p1356_p6 = por %p1355_p3, %p1354_p2 }
  0x48   : > { %p1350_p13 = pneg %p1349_p4 }
  0x4a   : > { %p1357_p8 = pnand %p1356_p6, %p1350_p13 }
  0x4c   : > { %1360 = shalt.err (!%p1357_p8)
}
  0x4d   : > { %s1516_s24 = smov 128   ;;  %s1517_s1 = smov 8  }
  0x4e   : > { %1229 = dma.hbm_to_vmem [thread:$0]  (!%p1672_p5), %s1988_s0, 256, %s1664_s12, [#allocation4], %s1516_s24, %s1516_s24, %s1517_s1  }
  0x4f   : > { %s1361_s27 = scalar_lea.hbm %s1679_s14, 64  ;;  %p2012_p8 = scmp.ne.s32.totalorder %s2008_s15, 0 }
  0x50   : > { %p1362_p6 = scmp.ne.s32.totalorder %s1679_s14, %s1361_s27  ;;  %s1366_s8 = scalar_lea.hbm %s1990_s2, 128 }
  0x51   : > { %p1367_p3 = scmp.lt.u32.totalorder %s1679_s14, %s1990_s2  ;;  %p1368_p7 = scmp.lt.u32.totalorder %s1366_s8, %s1361_s27 }
  0x52   : > { %p1364_p13 = pnand %p1362_p6, %p2012_p8  ;;  %p1370_p11 = scmp.lt.u32.totalorder %s1361_s27, %s1679_s14 }
  0x53   : > { %p1369_p9 = por %p1368_p7, %p1367_p3 }
  0x54   : > { %p1365_p2 = pneg %p1364_p13 }
  0x55   : > { %p1371_p12 = por %p1370_p11, %p1369_p9 }
  0x57   : > { %p1372_p10 = pnand %p1371_p12, %p1365_p2 }
  0x59   : > { %1375 = shalt.err (!%p1372_p10)
}
  0x5a   : > { %s1376_s12 = scalar_lea.vmem %s1681_s17, 64  ;;  %s1518_s7 = smov [#allocation8]  }
  0x5b   : > { %p1377_p5 = scmp.ne.s32.totalorder %s1681_s17, %s1376_s12  ;;  %s1381_s30 = sshll.u32 %s1518_s7, 4  ;;  %s1382_s30 = int_to_ptr.vmem [resolvable:$false] %s1381_s30 }
  0x5c   : > { %s1383_s6 = scalar_lea.vmem %s1382_s30, 128  ;;  %p1384_p4 = scmp.lt.s32.totalorder %s1681_s17, %s1382_s30 }
  0x5d   : > { %p1379_p0 = pnand %p1377_p5, %p2012_p8  ;;  %p1385_p6 = scmp.lt.s32.totalorder %s1383_s6, %s1376_s12 }
  0x5f   : > { %p1380_p1 = pneg %p1379_p0  ;;  %p1386_p13 = por %p1385_p6, %p1384_p4 }
  0x61   : > { %p1387_p3 = pnand %p1386_p13, %p1380_p1 }
  0x63   : > { %1390 = shalt.err (!%p1387_p3)
}
  0x64   : > { %p2013_p2 = scmp.ne.s32.totalorder %s2007_s10, 0  ;;  %s1007_s27 = sshll.u32 %s1505_s22, 13 }
  0x65   : > { %s2014_s16 = sshll.u32 %s1596_s28, 9  ;;  %s1735_s12 = scalar_lea.hbm %s1991_s3, %s1007_s27 }
  0x66   : > { %1236 = dma.hbm_to_vmem [thread:$0]  (!%p2013_p2), %s1679_s14, 64, %s1681_s17, %s1616_s13  }
  0x67   : > { %s267_s9 = scalar_lea.vmem [#allocation9], %s2014_s16  ;;  %s264_s7 = scalar_lea.sflag [#allocation10], %s1596_s28 }
  0x68   : > { %s274_s8 = sshll.u32 %s267_s9, 4  ;;  %s1391_s30 = scalar_lea.hbm %s1735_s12, 8192  ;;  %s1737_s8 = int_to_ptr.vmem [resolvable:$true] %s274_s8 }
  0x69   : > { %p1392_p7 = scmp.ne.s32.totalorder %s1735_s12, %s1391_s30  ;;  %s1396_s17 = scalar_lea.hbm %s1991_s3, 16384 }
  0x6a   : > { %p1397_p12 = scmp.lt.u32.totalorder %s1735_s12, %s1991_s3  ;;  %p1398_p10 = scmp.lt.u32.totalorder %s1396_s17, %s1391_s30 }
  0x6b   : > { %p1394_p9 = pnand %p1392_p7, %p2012_p8  ;;  %p1400_p0 = scmp.lt.u32.totalorder %s1391_s30, %s1735_s12 }
  0x6c   : > { %p1399_p5 = por %p1398_p10, %p1397_p12 }
  0x6d   : > { %p1395_p11 = pneg %p1394_p9 }
  0x6e   : > { %p1401_p1 = por %p1400_p0, %p1399_p5 }
  0x70   : > { %p1402_p4 = pnand %p1401_p1, %p1395_p11 }
  0x72   : > { %1405 = shalt.err (!%p1402_p4)
}
  0x73   : > { %s1406_s27 = scalar_lea.vmem %s1737_s8, 8192  ;;  %s1519_s9 = smov [#allocation9]  }
  0x74   : > { %p1407_p6 = scmp.ne.s32.totalorder %s1737_s8, %s1406_s27  ;;  %s1411_s11 = sshll.u32 %s1519_s9, 4  ;;  %s1412_s11 = int_to_ptr.vmem [resolvable:$false] %s1411_s11 }
  0x75   : > { %s1413_s18 = scalar_lea.vmem %s1412_s11, 16384  ;;  %p1414_p7 = scmp.lt.s32.totalorder %s1737_s8, %s1412_s11 }
  0x76   : > { %p1409_p13 = pnand %p1407_p6, %p2012_p8  ;;  %p1415_p9 = scmp.lt.s32.totalorder %s1413_s18, %s1406_s27 }
  0x78   : > { %p1410_p3 = pneg %p1409_p13  ;;  %p1416_p12 = por %p1415_p9, %p1414_p7 }
  0x7a   : > { %p1417_p10 = pnand %p1416_p12, %p1410_p3 }
  0x7c   : > { %1420 = shalt.err (!%p1417_p10)
}
  0x7d   : > { %1239 = dma.hbm_to_vmem [thread:$0]  (!%p2013_p2), %s1735_s12, 8192, %s1737_s8, %s264_s7, %s1516_s24, %s1516_s24, %s1517_s1  }
  0x7e   : > { %p2015_p8 = scmp.ne.s32.totalorder %s2010_s29, 0 }
  0x7f   : > { %p2016_p11 = scmp.eq.s32.totalorder (!%p2015_p8), %s1647_s25, 0 }
  0x80   : > { %286 = sbr.rel (%p2015_p8) target bundleno = 695 (0x2b7), region = 40 }
  0x87   : > { %1472 = dma.done.wait (%p2016_p11), [#allocation4], 256   ;;  %p2017_p5 = pmov %p2016_p11 }
  0x88   : > { %s292_s10 = sand.u32 1, %s1647_s25   ;;  %s294_s15 = sand.u32 1, %s1493_s19  }
  0x89   : > { %1474 = vsyncadd (%p2017_p5), [#allocation4], 4294967040  ;;  %s995_s30 = sshll.u32 %s294_s15, 9  ;;  %s293_s13 = scalar_lea.sflag [#allocation7], %s292_s10 }
  0x8a   : > { %s1774_s28 = scalar_lea.vmem [#allocation6], %s995_s30  ;;  %p2018_p0 = scmp.ne.s32.totalorder %s2009_s26, 0 }
  0x8c   : > { %1476 = dma.done.wait (%p2018_p0), %s293_s13, 8256  }
  0x8d   : > { %1478 = vsyncadd (%p2018_p0), %s293_s13, 4294959040  ;;  %s996_s29 = sshll.u32 %s294_s15, 2  ;;  %s311_s1 = scalar_lea.sflag [#allocation10], %s294_s15 }
  0x8e   : > { %s1780_s24 = scalar_lea.vmem [#allocation8], %s996_s29  ;;  %s1782_s8 = scalar_lea.vmem [#allocation9], %s995_s30 }
  0x8f   : > { %1480 = dma.done.wait (%p2018_p0), %s311_s1, 8192  }
  0x90   : > { %1482 = vsyncadd (%p2018_p0), %s311_s1, 4294959104  ;;  %p998_p2 = scmp.ne.s32.totalorder %s1501_s21, 0 }
  0x91   : > { %v999_v0 = vld [vmem:[%s1992_s4] ss:$0 sm:$0xff] (!%p998_p2) }
  0x92   : > { %354 = sbr.rel (%p998_p2) target bundleno = 153 (0x99), region = 60  ;;  %362 = vst [vmem:[#allocation2] sm:$0xff] (!%p998_p2), %v999_v0  ;;  %363 = vst [vmem:[#allocation2 + $0x8] sm:$0xff] (!%p998_p2), %v999_v0 }
  0x99 PF: > { %v367_v1 = vld [vmem:[%s1774_s28 + $0x8] sm:$0xff]  ;;  %v366_v3 = vld [vmem:[%s1774_s28] sm:$0xff]  ;;  %v1520_v8 = vmov 0.0   ;;  %v510_v46 = vld [vmem:[%s1782_s8 + $0x88] sm:$0xff]  ;;  %p1000_p1 = scmp.ne.s32.totalorder %s1501_s21, 1 }
  0x9a   : > { %v369_v2 = vld [vmem:[%s1774_s28 + $0x28] sm:$0xff]  ;;  %v368_v5 = vld [vmem:[%s1774_s28 + $0x20] sm:$0xff]  ;;  %474 = vmatprep.mubr.f32.mxu0 %v1520_v8  ;;  %v494_v49 = vld [vmem:[%s1782_s8 + $0x8] sm:$0xff] }
  0x9b   : > { %v1084_v4 = vpack.c.bf16 %v369_v2, %v367_v1  ;;  %v371_v6 = vld [vmem:[%s1774_s28 + $0x48] sm:$0xff]  ;;  %v1086_v9 = vpack.c.bf16 %v368_v5, %v366_v3  ;;  %v370_v11 = vld [vmem:[%s1774_s28 + $0x40] sm:$0xff]  ;;  %v511_v50 = vld [vmem:[%s1782_s8 + $0x90] sm:$0xff] }
  0x9c   : > { %v373_v7 = vld [vmem:[%s1774_s28 + $0x68] sm:$0xff]  ;;  %v372_v12 = vld [vmem:[%s1774_s28 + $0x60] sm:$0xff]  ;;  %v495_v55 = vld [vmem:[%s1782_s8 + $0x10] sm:$0xff] }
  0x9d   : > { %v1088_v10 = vpack.c.bf16 %v373_v7, %v371_v6  ;;  %v375_v13 = vld [vmem:[%s1774_s28 + $0x88] sm:$0xff]  ;;  %1085 = vmatprep.subr.bf16.mxu0 %v1084_v4  ;;  %v1090_v15 = vpack.c.bf16 %v372_v12, %v370_v11  ;;  %v374_v17 = vld [vmem:[%s1774_s28 + $0x80] sm:$0xff]  ;;  %v514_v61 = vld [vmem:[%s1782_s8 + $0xa8] sm:$0xff] }
  0x9e   : > { %v377_v14 = vld [vmem:[%s1774_s28 + $0xa8] sm:$0xff]  ;;  %1087 = vmatpush1.bf16.msra.mxu0 %v1086_v9  ;;  %v376_v18 = vld [vmem:[%s1774_s28 + $0xa0] sm:$0xff]  ;;  %v605_v62 = vld [vmem:[%s1774_s28 + $0x18] sm:$0xff] }
  0x9f   : > { %1089 = vmatprep.subr.bf16.mxu0 %v1088_v10  ;;  %v1092_v16 = vpack.c.bf16 %v377_v14, %v375_v13  ;;  %v379_v19 = vld [vmem:[%s1774_s28 + $0xc8] sm:$0xff]  ;;  %v1094_v21 = vpack.c.bf16 %v376_v18, %v374_v17  ;;  %v378_v23 = vld [vmem:[%s1774_s28 + $0xc0] sm:$0xff]  ;;  %v607_v63 = vld [vmem:[%s1774_s28 + $0x38] sm:$0xff] }
  0xa0   : > { %v381_v20 = vld [vmem:[%s1774_s28 + $0xe8] sm:$0xff]  ;;  %v380_v24 = vld [vmem:[%s1774_s28 + $0xe0] sm:$0xff]  ;;  %v498_v3 = vld [vmem:[%s1782_s8 + $0x28] sm:$0xff]  ;;  %v1148_v7 = vpack.c.bf16 %v607_v63, %v605_v62 }
  0xa1   : > { %v1096_v22 = vpack.c.bf16 %v381_v20, %v379_v19  ;;  %v383_v25 = vld [vmem:[%s1774_s28 + $0x108] sm:$0xff]  ;;  %v1098_v27 = vpack.c.bf16 %v380_v24, %v378_v23  ;;  %v382_v29 = vld [vmem:[%s1774_s28 + $0x100] sm:$0xff]  ;;  %v515_v5 = vld [vmem:[%s1782_s8 + $0xb0] sm:$0xff] }
  0xa2   : > { %1091 = vmatpush1.bf16.msra.mxu0 %v1090_v15  ;;  %v385_v26 = vld [vmem:[%s1774_s28 + $0x128] sm:$0xff]  ;;  %v384_v30 = vld [vmem:[%s1774_s28 + $0x120] sm:$0xff]  ;;  %v604_v9 = vld [vmem:[%s1774_s28 + $0x10] sm:$0xff] }
  0xa3   : > { %1093 = vmatprep.subr.bf16.mxu0 %v1092_v16  ;;  %v1100_v28 = vpack.c.bf16 %v385_v26, %v383_v25  ;;  %v387_v31 = vld [vmem:[%s1774_s28 + $0x148] sm:$0xff]  ;;  %v1102_v33 = vpack.c.bf16 %v384_v30, %v382_v29  ;;  %v386_v35 = vld [vmem:[%s1774_s28 + $0x140] sm:$0xff]  ;;  %v606_v10 = vld [vmem:[%s1774_s28 + $0x30] sm:$0xff] }
  0xa4   : > { %v389_v32 = vld [vmem:[%s1774_s28 + $0x168] sm:$0xff]  ;;  %v388_v36 = vld [vmem:[%s1774_s28 + $0x160] sm:$0xff]  ;;  %v609_v11 = vld [vmem:[%s1774_s28 + $0x58] sm:$0xff]  ;;  %v1150_v18 = vpack.c.bf16 %v606_v10, %v604_v9 }
  0xa5   : > { %v1104_v34 = vpack.c.bf16 %v389_v32, %v387_v31  ;;  %v391_v37 = vld [vmem:[%s1774_s28 + $0x188] sm:$0xff]  ;;  %v1106_v39 = vpack.c.bf16 %v388_v36, %v386_v35  ;;  %v390_v40 = vld [vmem:[%s1774_s28 + $0x180] sm:$0xff]  ;;  %v611_v12 = vld [vmem:[%s1774_s28 + $0x78] sm:$0xff] }
  0xa6   : > { %1095 = vmatpush1.bf16.msra.mxu0 %v1094_v21  ;;  %v393_v38 = vld [vmem:[%s1774_s28 + $0x1a8] sm:$0xff]  ;;  %v392_v42 = vld [vmem:[%s1774_s28 + $0x1a0] sm:$0xff]  ;;  %v499_v15 = vld [vmem:[%s1782_s8 + $0x30] sm:$0xff]  ;;  %v1152_v21 = vpack.c.bf16 %v611_v12, %v609_v11 }
  0xa7   : > { %1097 = vmatprep.subr.bf16.mxu0 %v1096_v22  ;;  %v1108_v41 = vpack.c.bf16 %v393_v38, %v391_v37  ;;  %v395_v43 = vld [vmem:[%s1774_s28 + $0x1c8] sm:$0xff]  ;;  %v512_v51 = vld [vmem:[%s1782_s8 + $0x98] sm:$0xff]  ;;  %v1110_v52 = vpack.c.bf16 %v392_v42, %v390_v40  ;;  %v1847_v17 = vld [vmem:[#allocation3] sm:$0xff] }
  0xa8   : > { %v397_v44 = vld [vmem:[%s1774_s28 + $0x1e8] sm:$0xff]  ;;  %v1120_v54 = vpack.c.bf16 %v512_v51, %v511_v50  ;;  %v496_v56 = vld [vmem:[%s1782_s8 + $0x18] sm:$0xff]  ;;  %v518_v20 = vld [vmem:[%s1782_s8 + $0xc8] sm:$0xff] }
  0xa9   : > { %v509_v45 = vld [vmem:[%s1782_s8 + $0x80] sm:$0xff]  ;;  %v1112_v58 = vpack.c.bf16 %v397_v44, %v395_v43  ;;  %v394_v59 = vld [vmem:[%s1774_s28 + $0x1c0] sm:$0xff]  ;;  %v1122_v0 = vpack.c.bf16 %v496_v56, %v495_v55  ;;  %v608_v22 = vld [vmem:[%s1774_s28 + $0x50] sm:$0xff] }
  0xaa   : > { %1099 = vmatpush1.bf16.msra.mxu0 %v1098_v27  ;;  %v493_v47 = vld [vmem:[%s1782_s8] sm:$0xff]  ;;  %v1116_v48 = vpack.c.bf16 %v510_v46, %v509_v45  ;;  %v396_v60 = vld [vmem:[%s1774_s28 + $0x1e0] sm:$0xff]  ;;  %v610_v23 = vld [vmem:[%s1774_s28 + $0x70] sm:$0xff] }
  0xab   : > { %1101 = vmatprep.subr.bf16.mxu0 %v1100_v28  ;;  %v1118_v53 = vpack.c.bf16 %v494_v49, %v493_v47  ;;  %v513_v57 = vld [vmem:[%s1782_s8 + $0xa0] sm:$0xff]  ;;  %v1114_v4 = vpack.c.bf16 %v396_v60, %v394_v59  ;;  %v516_v6 = vld [vmem:[%s1782_s8 + $0xb8] sm:$0xff]  ;;  %v613_v24 = vld [vmem:[%s1774_s28 + $0x98] sm:$0xff]  ;;  %v1154_v30 = vpack.c.bf16 %v610_v23, %v608_v22 }
  0xac   : > { %1117 = vmatprep.subr.bf16.mxu1 %v1116_v48  ;;  %v1124_v1 = vpack.c.bf16 %v514_v61, %v513_v57  ;;  %v497_v2 = vld [vmem:[%s1782_s8 + $0x20] sm:$0xff]  ;;  %v1128_v14 = vpack.c.bf16 %v516_v6, %v515_v5  ;;  %v500_v16 = vld [vmem:[%s1782_s8 + $0x38] sm:$0xff]  ;;  %v615_v25 = vld [vmem:[%s1774_s28 + $0xb8] sm:$0xff] }
  0xad   : > { %1119 = vmatpush3.bf16.msra.mxu1 %v1118_v53  ;;  %v1126_v13 = vpack.c.bf16 %v498_v3, %v497_v2  ;;  %v517_v19 = vld [vmem:[%s1782_s8 + $0xc0] sm:$0xff]  ;;  %v1130_v26 = vpack.c.bf16 %v500_v16, %v499_v15  ;;  %v502_v29 = vld [vmem:[%s1782_s8 + $0x48] sm:$0xff]  ;;  %v1859_v31 = vld [vmem:[#allocation3 + $0x8] sm:$0xff] }
  0xae   : > { %1103 = vmatpush1.bf16.msra.mxu0 %v1102_v33  ;;  %1121 = vmatprep.subr.bf16.mxu1 %v1120_v54  ;;  %v1132_v27 = vpack.c.bf16 %v518_v20, %v517_v19  ;;  %v501_v28 = vld [vmem:[%s1782_s8 + $0x40] sm:$0xff]  ;;  %v519_v32 = vld [vmem:[%s1782_s8 + $0xd0] sm:$0xff]  ;;  %v520_v33 = vld [vmem:[%s1782_s8 + $0xd8] sm:$0xff] }
  0xaf   : > { %1105 = vmatprep.subr.bf16.mxu0 %v1104_v34  ;;  %v1156_v34 = vpack.c.bf16 %v615_v25, %v613_v24  ;;  %v612_v35 = vld [vmem:[%s1774_s28 + $0x90] sm:$0xff]  ;;  %v617_v37 = vld [vmem:[%s1774_s28 + $0xd8] sm:$0xff]  ;;  %v1136_v40 = vpack.c.bf16 %v520_v33, %v519_v32  ;;  %v504_v42 = vld [vmem:[%s1782_s8 + $0x58] sm:$0xff]  ;;  %v400_v24 = vlaneseq }
  0xb0   : > { %v614_v36 = vld [vmem:[%s1774_s28 + $0xb0] sm:$0xff]  ;;  %v619_v38 = vld [vmem:[%s1774_s28 + $0xf8] sm:$0xff]  ;;  %v521_v44 = vld [vmem:[%s1782_s8 + $0xe0] sm:$0xff] }
  0xb1   : > { %1123 = vmatpush3.bf16.msra.mxu1 %v1122_v0  ;;  %v1158_v43 = vpack.c.bf16 %v614_v36, %v612_v35  ;;  %v522_v45 = vld [vmem:[%s1782_s8 + $0xe8] sm:$0xff]  ;;  %v1160_v46 = vpack.c.bf16 %v619_v38, %v617_v37  ;;  %v621_v49 = vld [vmem:[%s1774_s28 + $0x118] sm:$0xff]  ;;  %v1902_v25 = vshrl.u32 %v400_v24, 7  ;;  %v750_v38 = vld [vmem:[%s1782_s8 + $0x198] sm:$0xff] }
  0xb2   : > { %1107 = vmatpush1.bf16.msra.mxu0 %v1106_v39  ;;  %1125 = vmatprep.subr.bf16.mxu1 %v1124_v1  ;;  %v1134_v39 = vpack.c.bf16 %v502_v29, %v501_v28  ;;  %v616_v47 = vld [vmem:[%s1774_s28 + $0xd0] sm:$0xff]  ;;  %v623_v50 = vld [vmem:[%s1774_s28 + $0x138] sm:$0xff]  ;;  %v746_v24 = vld [vmem:[%s1782_s8 + $0x178] sm:$0xff] }
  0xb3   : > { %1109 = vmatprep.subr.bf16.mxu0 %v1108_v41  ;;  %v503_v41 = vld [vmem:[%s1782_s8 + $0x50] sm:$0xff]  ;;  %v618_v48 = vld [vmem:[%s1774_s28 + $0xf0] sm:$0xff]  ;;  %v1164_v54 = vpack.c.bf16 %v623_v50, %v621_v49  ;;  %v406_v28 = vsub.s32 1, %v1902_v25 }
  0xb4   : > { %v1138_v51 = vpack.c.bf16 %v504_v42, %v503_v41  ;;  %v1162_v53 = vpack.c.bf16 %v618_v48, %v616_v47  ;;  %v620_v55 = vld [vmem:[%s1774_s28 + $0x110] sm:$0xff]  ;;  %v625_v57 = vld [vmem:[%s1774_s28 + $0x158] sm:$0xff]  ;;  %v751_v48 = vld [vmem:[%s1782_s8 + $0x1a0] sm:$0xff] }
  0xb5   : > { %1127 = vmatpush3.bf16.msra.mxu1 %v1126_v13  ;;  %v622_v56 = vld [vmem:[%s1774_s28 + $0x130] sm:$0xff]  ;;  %v629_v63 = vld [vmem:[%s1774_s28 + $0x198] sm:$0xff]  ;;  %v505_v13 = vld [vmem:[%s1782_s8 + $0x60] sm:$0xff] }
  0xb6   : > { %1111 = vmatpush1.bf16.msra.mxu0 %v1110_v52  ;;  %1129 = vmatprep.subr.bf16.mxu1 %v1128_v14  ;;  %v1140_v52 = vpack.c.bf16 %v522_v45, %v521_v44  ;;  %v1166_v59 = vpack.c.bf16 %v622_v56, %v620_v55  ;;  %v624_v61 = vld [vmem:[%s1774_s28 + $0x150] sm:$0xff]  ;;  %v631_v0 = vld [vmem:[%s1774_s28 + $0x1b8] sm:$0xff]  ;;  %v734_v45 = vld [vmem:[%s1782_s8 + $0x118] sm:$0xff] }
  0xb7   : > { %1113 = vmatprep.subr.bf16.mxu0 %v1112_v58  ;;  %v627_v58 = vld [vmem:[%s1774_s28 + $0x178] sm:$0xff]  ;;  %v626_v62 = vld [vmem:[%s1774_s28 + $0x170] sm:$0xff]  ;;  %v1172_v2 = vpack.c.bf16 %v631_v0, %v629_v63  ;;  %v735_v55 = vld [vmem:[%s1782_s8 + $0x120] sm:$0xff] }
  0xb8   : > { %v1168_v60 = vpack.c.bf16 %v627_v58, %v625_v57  ;;  %v1170_v1 = vpack.c.bf16 %v626_v62, %v624_v61  ;;  %v628_v3 = vld [vmem:[%s1774_s28 + $0x190] sm:$0xff]  ;;  %v633_v5 = vld [vmem:[%s1774_s28 + $0x1d8] sm:$0xff]  ;;  %v754_v58 = vld [vmem:[%s1782_s8 + $0x1b8] sm:$0xff] }
  0xb9   : > { %1131 = vmatpush3.bf16.msra.mxu1 %v1130_v26  ;;  %v635_v6 = vld [vmem:[%s1774_s28 + $0x1f8] sm:$0xff]  ;;  %v632_v10 = vld [vmem:[%s1774_s28 + $0x1d0] sm:$0xff]  ;;  %v402_v26 = vsub.s32 0, %v1902_v25  ;;  %v738_v62 = vld [vmem:[%s1782_s8 + $0x138] sm:$0xff] }
  0xba   : > { %1115 = vmatpush1.bf16.msra.mxu0 %v1114_v4  ;;  %1133 = vmatprep.subr.bf16.mxu1 %v1132_v27  ;;  %v630_v4 = vld [vmem:[%s1774_s28 + $0x1b0] sm:$0xff]  ;;  %v1176_v9 = vpack.c.bf16 %v635_v6, %v633_v5  ;;  %v523_v16 = vld [vmem:[%s1782_s8 + $0xf0] sm:$0xff]  ;;  %v398_v27 = vld [vmem:[%s1780_s24] sm:$0x3] }
  0xbb   : > { %1149 = vmatprep.subr.bf16.mxu0 %v1148_v7  ;;  %v1174_v7 = vpack.c.bf16 %v630_v4, %v628_v3  ;;  %v634_v11 = vld [vmem:[%s1774_s28 + $0x1f0] sm:$0xff]  ;;  %v507_v20 = vld [vmem:[%s1782_s8 + $0x70] sm:$0xff]  ;;  %v403_v29 = vrot.slane %v398_v27, %v402_v26  ;;  %v755_v63 = vld [vmem:[%s1782_s8 + $0x1c0] sm:$0xff] }
  0xbc   : > { %v1178_v12 = vpack.c.bf16 %v634_v11, %v632_v10  ;;  %v506_v14 = vld [vmem:[%s1782_s8 + $0x68] sm:$0xff]  ;;  %v749_v37 = vld [vmem:[%s1782_s8 + $0x190] sm:$0xff]  ;;  %v739_v3 = vld [vmem:[%s1782_s8 + $0x140] sm:$0xff] }
  0xbd   : > { %475 = vmatmul.mubr.f32.vlgmr.msra.gmra.mrb[0].mxu0 %v1847_v17  ;;  %1135 = vmatpush3.bf16.msra.mxu1 %v1134_v39  ;;  %v1142_v15 = vpack.c.bf16 %v506_v14, %v505_v13  ;;  %v748_v23 = vld [vmem:[%s1782_s8 + $0x188] sm:$0xff]  ;;  %v733_v44 = vld [vmem:[%s1782_s8 + $0x110] sm:$0xff]  ;;  %v758_v6 = vld [vmem:[%s1782_s8 + $0x1d8] sm:$0xff] }
  0xbe   : > { %1151 = vmatpush1.bf16.msra.mxu0 %v1150_v18  ;;  %480 = vmatprep.mubr.f32.mxu0 %v1520_v8  ;;  %v524_v18 = vld [vmem:[%s1782_s8 + $0xf8] sm:$0xff]  ;;  %v732_v35 = vld [vmem:[%s1782_s8 + $0x108] sm:$0xff]  ;;  %v753_v57 = vld [vmem:[%s1782_s8 + $0x1b0] sm:$0xff] }
  0xbf   : > { %1153 = vmatprep.subr.bf16.mxu0 %v1152_v21  ;;  %1137 = vmatprep.subr.bf16.mxu1 %v1136_v40  ;;  %v1144_v19 = vpack.c.bf16 %v524_v18, %v523_v16  ;;  %v508_v21 = vld [vmem:[%s1782_s8 + $0x78] sm:$0xff]  ;;  %v752_v49 = vld [vmem:[%s1782_s8 + $0x1a8] sm:$0xff]  ;;  %v737_v61 = vld [vmem:[%s1782_s8 + $0x130] sm:$0xff] }
  0xc0   : > { %v1146_v22 = vpack.c.bf16 %v508_v21, %v507_v20  ;;  %v736_v56 = vld [vmem:[%s1782_s8 + $0x128] sm:$0xff]  ;;  %v757_v5 = vld [vmem:[%s1782_s8 + $0x1d0] sm:$0xff]  ;;  %v742_v11 = vld [vmem:[%s1782_s8 + $0x158] sm:$0xff] }
  0xc1   : > { %481 = vmatmul.mubr.f32.gmra.mrb[2].mxu0 %v1859_v31  ;;  %1139 = vmatpush3.bf16.msra.mxu1 %v1138_v51  ;;  %v756_v0 = vld [vmem:[%s1782_s8 + $0x1c8] sm:$0xff]  ;;  %v741_v10 = vld [vmem:[%s1782_s8 + $0x150] sm:$0xff]  ;;  %v743_v16 = vld [vmem:[%s1782_s8 + $0x160] sm:$0xff] }
  0xc2   : > { %1155 = vmatpush1.bf16.msra.mxu0 %v1154_v30  ;;  %712 = vmatprep.mubr.f32.mxu0 %v1520_v8  ;;  %v407_v30 = vrot.slane %v398_v27, %v406_v28  ;;  %v740_v4 = vld [vmem:[%s1782_s8 + $0x148] sm:$0xff]  ;;  %v1202_v14 = vpack.c.bf16 %v742_v11, %v741_v10  ;;  %v761_v20 = vld [vmem:[%s1782_s8 + $0x1f0] sm:$0xff]  ;;  %v762_v21 = vld [vmem:[%s1782_s8 + $0x1f8] sm:$0xff] }
  0xc3   : > { %1157 = vmatprep.subr.bf16.mxu0 %v1156_v34  ;;  %1141 = vmatprep.subr.bf16.mxu1 %v1140_v52  ;;  %v731_v34 = vld [vmem:[%s1782_s8 + $0x100] sm:$0xff]  ;;  %v1186_v52 = vpack.c.bf16 %v734_v45, %v733_v44  ;;  %v760_v13 = vld [vmem:[%s1782_s8 + $0x1e8] sm:$0xff]  ;;  %v491_v45 = vld [vmem:[#allocation2] sm:$0xff] }
  0xc4   : > { %v1182_v41 = vpack.c.bf16 %v732_v35, %v731_v34  ;;  %v744_v18 = vld [vmem:[%s1782_s8 + $0x168] sm:$0xff] }
  0xc5   : > { %1143 = vmatpush3.bf16.msra.mxu1 %v1142_v15 }
  0xc6   : > { %1159 = vmatpush1.bf16.msra.mxu0 %v1158_v43  ;;  %1145 = vmatprep.subr.bf16.mxu1 %v1144_v19  ;;  %v1184_v43 = vpack.c.bf16 %v750_v38, %v749_v37  ;;  %v636_v19 = vld [vmem:[%s1780_s24 + $0x2] sm:$0x3] }
  0xc7   : > { %1161 = vmatprep.subr.bf16.mxu0 %v1160_v46  ;;  %v645_v27 = vrot.slane %v636_v19, %v406_v28 }
  0xc9   : > { %1147 = vmatpush3.bf16.msra.mxu1 %v1146_v22  ;;  %v1206_v22 = vpack.c.bf16 %v744_v18, %v743_v16 }
  0xca   : > { %1163 = vmatpush1.bf16.msra.mxu0 %v1162_v53 }
  0xcb   : > { %1165 = vmatprep.subr.bf16.mxu0 %v1164_v54  ;;  %v1188_v54 = vpack.c.bf16 %v752_v49, %v751_v48 }
  0xce   : > { %1167 = vmatpush1.bf16.msra.mxu0 %v1166_v59  ;;  %v1190_v59 = vpack.c.bf16 %v736_v56, %v735_v55 }
  0xcf   : > { %1169 = vmatprep.subr.bf16.mxu0 %v1168_v60  ;;  %v1192_v60 = vpack.c.bf16 %v754_v58, %v753_v57 }
  0xd2   : > { %1171 = vmatpush1.bf16.msra.mxu0 %v1170_v1  ;;  %v1194_v1 = vpack.c.bf16 %v738_v62, %v737_v61 }
  0xd3   : > { %1173 = vmatprep.subr.bf16.mxu0 %v1172_v2  ;;  %v1196_v2 = vpack.c.bf16 %v756_v0, %v755_v63 }
  0xd6   : > { %1175 = vmatpush1.bf16.msra.mxu0 %v1174_v7  ;;  %v1198_v7 = vpack.c.bf16 %v740_v4, %v739_v3 }
  0xd7   : > { %1177 = vmatprep.subr.bf16.mxu0 %v1176_v9  ;;  %v1200_v9 = vpack.c.bf16 %v758_v6, %v757_v5 }
  0xda   : > { %1179 = vmatpush1.bf16.msra.mxu0 %v1178_v12  ;;  %v759_v12 = vld [vmem:[%s1782_s8 + $0x1e0] sm:$0xff] }
  0xdb   : > { %v1204_v15 = vpack.c.bf16 %v760_v13, %v759_v12 }
  0xdd   : > { %713 = vmatmul.mubr.f32.vlgmr.msra.gmra.mrb[4].mxu0 %v1847_v17  ;;  %v747_v17 = vld [vmem:[%s1782_s8 + $0x180] sm:$0xff] }
  0xde   : > { %718 = vmatprep.mubr.f32.mxu0 %v1520_v8  ;;  %v1180_v8 = vpack.c.bf16 %v748_v23, %v747_v17  ;;  %v641_v17 = vrot.slane %v636_v19, %v402_v26  ;;  %v1208_v23 = vpack.c.bf16 %v762_v21, %v761_v20 }
  0xe0   : > { %1181 = vmatprep.subr.bf16.mxu1 %v1180_v8  ;;  %v745_v8 = vld [vmem:[%s1782_s8 + $0x170] sm:$0xff] }
  0xe1   : > { %719 = vmatmul.mubr.f32.gmra.mrb[6].mxu0 %v1859_v31 }
 0x190   : > { %v476_v31 = vpop.f32.mrb[0].mxu0 }
 0x191   : > { %v477_v32 = vadd.f32 %v476_v31, %v403_v29  ;;  %v478_v33 = vpop.f32.mrb[1].mxu0 }
 0x192   : > { %v479_v36 = vadd.f32 %v478_v33, %v407_v30 }
 0x193   : > { %v487_v39 = vmax.f32 %v477_v32, 0.0 }
 0x194   : > { %v488_v40 = vmax.f32 %v479_v36, 0.0  ;;  %v482_v42 = vpop.f32.mrb[2].mxu0 }
 0x195   : > { %v483_v46 = vadd.f32 %v482_v42, %v403_v29  ;;  %v484_v47 = vpop.f32.mrb[3].mxu0 }
 0x196   : > { %589 = vmatprep.mubr.f32.mxu1 %v488_v40  ;;  %v485_v50 = vadd.f32 %v484_v47, %v407_v30  ;;  %v1210_v30 = vpack.c.bf16 %v746_v24, %v745_v8 }
 0x197   : > { %590 = vmatmul.mubr.f32.vlgmr.msra.gmra.mrb[0].mxu1 %v487_v39  ;;  %v489_v51 = vmax.f32 %v483_v46, 0.0 }
 0x198   : > { %1183 = vmatpush3.bf16.msra.mxu1 %v1182_v41  ;;  %v490_v53 = vmax.f32 %v485_v50, 0.0  ;;  %v492_v50 = vld [vmem:[#allocation2 + $0x8] sm:$0xff] }
 0x199   : > { %1185 = vmatprep.subr.bf16.mxu1 %v1184_v43 }
 0x19a   : > { %594 = vmatprep.mubr.f32.mxu1 %v490_v53 }
 0x19b   : > { %595 = vmatmul.mubr.f32.gmra.mrb[2].mxu1 %v489_v51 }
 0x19c   : > { %1187 = vmatpush3.bf16.msra.mxu1 %v1186_v52 }
 0x19d   : > { %1189 = vmatprep.subr.bf16.mxu1 %v1188_v54 }
 0x1a0   : > { %1191 = vmatpush3.bf16.msra.mxu1 %v1190_v59 }
 0x1a1   : > { %1193 = vmatprep.subr.bf16.mxu1 %v1192_v60 }
 0x1a4   : > { %1195 = vmatpush3.bf16.msra.mxu1 %v1194_v1 }
 0x1a5   : > { %1197 = vmatprep.subr.bf16.mxu1 %v1196_v2 }
 0x1a8   : > { %1199 = vmatpush3.bf16.msra.mxu1 %v1198_v7 }
 0x1a9   : > { %1201 = vmatprep.subr.bf16.mxu1 %v1200_v9 }
 0x1ac   : > { %1203 = vmatpush3.bf16.msra.mxu1 %v1202_v14 }
 0x1ad   : > { %1205 = vmatprep.subr.bf16.mxu1 %v1204_v15 }
 0x1b0   : > { %v714_v29 = vpop.f32.mrb[4].mxu0  ;;  %1207 = vmatpush3.bf16.msra.mxu1 %v1206_v22 }
 0x1b1   : > { %v715_v31 = vadd.f32 %v714_v29, %v641_v17  ;;  %v716_v32 = vpop.f32.mrb[5].mxu0  ;;  %1209 = vmatprep.subr.bf16.mxu1 %v1208_v23 }
 0x1b2   : > { %v717_v33 = vadd.f32 %v716_v32, %v645_v27 }
 0x1b3   : > { %v725_v36 = vmax.f32 %v715_v31, 0.0 }
 0x1b4   : > { %v726_v34 = vmax.f32 %v717_v33, 0.0  ;;  %v720_v35 = vpop.f32.mrb[6].mxu0  ;;  %1211 = vmatpush3.bf16.msra.mxu1 %v1210_v30 }
 0x1b5   : > { %v721_v37 = vadd.f32 %v720_v35, %v641_v17  ;;  %v722_v38 = vpop.f32.mrb[7].mxu0 }
 0x1b6   : > { %v723_v26 = vadd.f32 %v722_v38, %v645_v27  ;;  %827 = vmatprep.mubr.f32.mxu1 %v726_v34 }
 0x1b7   : > { %828 = vmatmul.mubr.f32.vlgmr.msra.gmra.mrb[4].mxu1 %v725_v36  ;;  %v727_v40 = vmax.f32 %v721_v37, 0.0 }
 0x1b8   : > { %v728_v39 = vmax.f32 %v723_v26, 0.0 }
 0x1ba   : > { %832 = vmatprep.mubr.f32.mxu1 %v728_v39 }
 0x1bb   : > { %833 = vmatmul.mubr.f32.gmra.mrb[6].mxu1 %v727_v40 }
 0x26a   : > { %v1040_v25 = vpop.f32.mrb[0].mxu1 }
 0x26b   : > { %v1041_v28 = vpop.f32.mrb[1].mxu1 }
 0x26c   : > { %v1042_v41 = vadd.f32 %v1041_v28, %v1040_v25 }
 0x26e   : > { %v1043_v42 = vpop.f32.mrb[2].mxu1  ;;  %v600_v48 = vadd.f32 %v1042_v41, %v491_v45 }
 0x26f   : > { %v1044_v43 = vpop.f32.mrb[3].mxu1 }
 0x270   : > { %v1045_v44 = vadd.f32 %v1044_v43, %v1043_v42 }
 0x272   : > { %v601_v54 = vadd.f32 %v1045_v44, %v492_v50 }
 0x28a   : > { %v1078_v46 = vpop.f32.mrb[4].mxu1 }
 0x28b   : > { %v1079_v47 = vpop.f32.mrb[5].mxu1 }
 0x28c   : > { %v1080_v49 = vadd.f32 %v1079_v47, %v1078_v46 }
 0x28e   : > { %v838_v51 = vadd.f32 %v1080_v49, %v600_v48  ;;  %v1081_v52 = vpop.f32.mrb[6].mxu1  ;;  %845 = sbr.rel (%p1000_p1) target bundleno = 669 (0x29d), region = 64 }
 0x28f   : > { %v1082_v53 = vpop.f32.mrb[7].mxu1 }
 0x290   : > { %840 = vst [vmem:[#allocation2] sm:$0xff] %v838_v51  ;;  %v1083_v55 = vadd.f32 %v1082_v53, %v1081_v52 }
 0x292   : > { %v839_v56 = vadd.f32 %v1083_v55, %v601_v54 }
 0x294   : > { %841 = vst [vmem:[#allocation2 + $0x8] sm:$0xff] %v839_v56 }
 0x297   : > { %v846_v57 = vld [vmem:[#allocation2] sm:$0xff] }
 0x298   : > { %848 = vst [vmem:[#allocation11] sm:$0xff] %v846_v57 }
 0x29b   : > { %v847_v58 = vld [vmem:[#allocation2 + $0x8] sm:$0xff] }
 0x29c   : > { %849 = vst [vmem:[#allocation11 + $0x8] sm:$0xff] %v847_v58 }
 0x29d PF: > { %p1243_p4 = scmp.eq.s32.totalorder %s1647_s25, 1  ;;  %s1521_s26 = smov [#allocation11]  }
 0x29e   : > { %s859_s14 = sshll.u32 %s1521_s26, 4  ;;  %s860_s14 = int_to_ptr.vmem [resolvable:$true] %s859_s14 }
 0x29f   : > { %s1421_s17 = scalar_lea.vmem %s860_s14, 256  ;;  %p1428_p7 = scmp.lt.s32.totalorder %s860_s14, %s860_s14 }
 0x2a0   : > { %p1422_p6 = scmp.ne.s32.totalorder %s860_s14, %s1421_s17  ;;  %p1429_p9 = scmp.lt.s32.totalorder %s1421_s17, %s1421_s17 }
 0x2a2   : > { %p1423_p13 = pnand %p1422_p6, %p1243_p4  ;;  %p1430_p12 = por %p1429_p9, %p1428_p7 }
 0x2a4   : > { %p1424_p3 = pneg %p1423_p13 }
 0x2a6   : > { %p1431_p10 = pnand %p1430_p12, %p1424_p3 }
 0x2a8   : > { %1434 = shalt.err (!%p1431_p10)
}
 0x2a9   : > { %s1435_s16 = scalar_lea.hbm %s1993_s5, 256 }
 0x2aa   : > { %p1436_p8 = scmp.ne.s32.totalorder %s1993_s5, %s1435_s16  ;;  %p1441_p0 = scmp.lt.u32.totalorder %s1435_s16, %s1993_s5 }
 0x2ac   : > { %p1437_p11 = pnand %p1436_p8, %p1243_p4 }
 0x2ae   : > { %p1438_p5 = pneg %p1437_p11 }
 0x2b0   : > { %p1443_p2 = pnand %p1441_p0, %p1438_p5 }
 0x2b2   : > { %1446 = shalt.err (!%p1443_p2)
}
 0x2b3   : > { %s1522_s10 = smov 128   ;;  %s1523_s15 = smov 8  }
 0x2b4   : > { %1223 = dma.vmem_to_hbm [thread:$0]  (%p1243_p4), %s860_s14, 256, %s1993_s5, [#allocation5], %s1522_s10, %s1522_s10, %s1523_s15  }
 0x2b5   : > { %1484 = dma.done.wait (%p1243_p4), [#allocation5], 256  }
 0x2b6   : > { %1486 = vsyncadd (%p1243_p4), [#allocation5], 4294967040 }
 0x2b7 PF: > { %s23_s23 = sadd.s32 1, %s1509_s23   ;;  %s2019_s28 = sld [smem:[#allocation17_spill]] }
 0x2b8   : > { %p20_p1 = scmp.ge.s32.totalorder %s23_s23, 4   ;;  %s2020_s29 = sld [smem:[#allocation16_spill]] }
 0x2b9   : > { %s2021_s18 = smov %s1493_s19  ;;  %s2022_s19 = smov %s1497_s20 }
 0x2ba   : > { %s2024_s21 = smov %s1505_s22  ;;  %22 = sbr.rel (!%p20_p1) target bundleno = 10 (0xa), region = 116 }
 0x2bd   : > { %s2023_s20 = smov %s2019_s28 }
 0x2be   : > { %s2025_s22 = smov %s2020_s29 }
 0x2c1   :  { %875 = vsyncpa [#allocation4], 1 }
 0x2c2   :  { %877 = vsyncpa [#allocation4 + $0x1], 1 }
 0x2c3   :  { %878 = vsyncpa [#allocation7], 1 }
 0x2c4   :  { %880 = vsyncpa [#allocation7 + $0x1], 1 }
 0x2c5   :  { %881 = vsyncpa [#allocation10], 1 }
 0x2c6   :  { %883 = vsyncpa [#allocation10 + $0x1], 1 }
 0x2c7   :  { %884 = vsyncpa [#allocation5], 1 }
 0x2c8   :  { %886 = vsyncpa [#allocation5 + $0x1], 1 }

</bundles_post_ra>
